<compile_context>
chip_gen: v6e
topology: v6e:2x2x1
jax: 0.10.0
libtpu: 0.0.40
codegen_flags: <defaults>
</compile_context>

<pallas_src>
import functools

import jax
import jax.numpy as jnp
from jax.experimental import pallas as pl
from jax.experimental.pallas import tpu as pltpu

LANE = 128


def _round_up(x, m):
    return (x + m - 1) // m * m


# ---------------------------------------------------------------------------
# Kernel: one grid step == one decoder step.
# ---------------------------------------------------------------------------
def _decoder_steps_kernel(G,
                          x_ref, h0_ref, wcat_ref, bcat_ref, wout_ref, bout_ref,
                          logp_ref, hout_ref,
                          h_scr):
    step = pl.program_id(0)

    @pl.when(step == 0)
    def _():
        h_scr[...] = h0_ref[...]

    # ReLU on the (flattened, zero-padded) input token vector.
    x = jnp.maximum(x_ref[0], 0.0)                 # (1, T_pad) f32
    h = h_scr[...]                                 # (1, H_pad) f32

    # Single fused gate matmul: [x | h] @ [r_sum | z_sum | i_n | h_n].
    xh = jnp.concatenate([x, h], axis=-1).astype(wcat_ref.dtype)
    g = jnp.dot(xh, wcat_ref[...],
                preferred_element_type=jnp.float32) + bcat_ref[...]  # (1, 4G) f32

    r = jax.nn.sigmoid(g[:, 0:G])
    z = jax.nn.sigmoid(g[:, G:2 * G])
    i_n = g[:, 2 * G:3 * G]
    h_n = g[:, 3 * G:4 * G]
    n = jnp.tanh(i_n + r * h_n)
    h_new = (1.0 - z) * n + z * h                  # (1, H_pad) f32

    h_scr[...] = h_new
    hout_ref[...] = h_new                          # resident output block

    # Linear head + log-softmax.  Padded logit lanes carry a -1e30 bias so
    # they contribute nothing to max/sum; the wrapper slices them off.
    logits = jnp.dot(h_new.astype(wout_ref.dtype), wout_ref[...],
                     preferred_element_type=jnp.float32) + bout_ref[...]  # (1, O_pad)
    m = jnp.max(logits, axis=-1, keepdims=True)
    shifted = logits - m
    logz = jnp.log(jnp.sum(jnp.exp(shifted), axis=-1, keepdims=True))
    logp_ref[0] = (shifted - logz).astype(logp_ref.dtype)


# ---------------------------------------------------------------------------
# Wrappers
# ---------------------------------------------------------------------------
def decoder_rnn_forward_seq(x_seq, hidden, packed):
    """Runs N decoder steps (teacher-forced inputs) in ONE pallas_call.

    x_seq  : (N, total_tokens)  (each row is one step's input, pre-ReLU)
    hidden : (1, 1, hidden_size) initial hidden state
    packed : output of pack_params()
    Returns (log_probs (N, output_size), final hidden (1, 1, hidden_size)).
    """
    T, H, O = packed["dims"]
    T_pad, H_pad, O_pad, G = packed["pads"]

    x2 = x_seq.reshape(x_seq.shape[0], 1, T).astype(jnp.float32)
    N = x2.shape[0]
    x_p = jnp.pad(x2, ((0, 0), (0, 0), (0, T_pad - T)))
    h_p = jnp.pad(hidden.reshape(1, H).astype(jnp.float32),
                  ((0, 0), (0, H_pad - H)))

    kernel = functools.partial(_decoder_steps_kernel, G)

    logp_pad, h_out_pad = pl.pallas_call(
        kernel,
        grid=(N,),
        in_specs=[
            pl.BlockSpec((1, 1, T_pad), lambda s: (s, 0, 0)),         # x per step
            pl.BlockSpec((1, H_pad), lambda s: (0, 0)),               # h0 (resident)
            pl.BlockSpec((T_pad + H_pad, 4 * G), lambda s: (0, 0)),   # fused gate W
            pl.BlockSpec((1, 4 * G), lambda s: (0, 0)),               # fused gate b
            pl.BlockSpec((H_pad, O_pad), lambda s: (0, 0)),           # head W
            pl.BlockSpec((1, O_pad), lambda s: (0, 0)),               # head b
        ],
        out_specs=(
            pl.BlockSpec((1, 1, O_pad), lambda s: (s, 0, 0)),         # log-probs/step
            pl.BlockSpec((1, H_pad), lambda s: (0, 0)),               # final hidden
        ),
        out_shape=(
            jax.ShapeDtypeStruct((N, 1, O_pad), jnp.float32),
            jax.ShapeDtypeStruct((1, H_pad), jnp.float32),
        ),
        scratch_shapes=[pltpu.VMEM((1, H_pad), jnp.float32)],
        compiler_params=pltpu.CompilerParams(
            dimension_semantics=("arbitrary",)),    # sequential recurrence
    )(x_p, h_p, packed["w_cat"], packed["b_cat"],
      packed["w_out"], packed["b_out"])

    log_probs = logp_pad[:, 0, :O]                  # (N, O)
    h_final = h_out_pad[:, :H].reshape(1, 1, H)
    return log_probs, h_final


def decoder_rnn_forward(inp, hidden, packed):
    """Single step == the literal PyTorch DecoderRNN.forward()."""
    T = packed["dims"][0]
    logp, h_new = decoder_rnn_forward_seq(inp.reshape(1, T), hidden, packed)
    return logp, h_new


# ---------------------------------------------------------------------------
# Parameters
# ---------------------------------------------------------------------------
def init_params(key, total_tokens, hidden_size, output_size):
    """PyTorch-ish uniform init; GRU gate order [r|z|n], weights stored [in,out]."""
    ks = jax.random.split(key, 6)
    s = 1.0 / jnp.sqrt(hidden_size)
    w_ih_t = jax.random.uniform(ks[0], (total_tokens, 3 * hidden_size),
                                jnp.float32, -s, s)
    w_hh_t = jax.random.uniform(ks[1], (hidden_size, 3 * hidden_size),
                                jnp.float32, -s, s)
    b_ih = jax.random.uniform(ks[2], (1, 3 * hidden_size), jnp.float32, -s, s)
    b_hh = jax.random.uniform(ks[3], (1, 3 * hidden_size), jnp.float32, -s, s)
    w_out_t = jax.random.uniform(ks[4], (hidden_size, output_size),
                                 jnp.float32, -s, s)
    b_out = jax.random.uniform(ks[5], (1, output_size), jnp.float32, -s, s)
    return dict(w_ih_t=w_ih_t, w_hh_t=w_hh_t, b_ih=b_ih, b_hh=b_hh,
                w_out_t=w_out_t, b_out=b_out)


def pack_params(params, weight_dtype=jnp.bfloat16):
    """Pack PyTorch-layout GRU+Linear params into the fused, 128-lane-aligned,
    bf16 layout the kernel consumes."""
    w_ih_t = params["w_ih_t"]
    w_hh_t = params["w_hh_t"]
    b_ih = params["b_ih"].reshape(-1)
    b_hh = params["b_hh"].reshape(-1)
    w_out_t = params["w_out_t"]
    b_out = params["b_out"].reshape(-1)

    T = w_ih_t.shape[0]
    H = w_hh_t.shape[0]
    O = w_out_t.shape[1]
    assert H <= LANE, "this packing assumes hidden_size <= 128"

    G = LANE                       # per-gate lane-aligned width
    T_pad = _round_up(T, LANE)
    H_pad = G
    O_pad = _round_up(O, LANE)

    # Fused gate weight: rows [x_pad | h_pad], cols [r_sum | z_sum | i_n | h_n]
    w_cat = jnp.zeros((T_pad + H_pad, 4 * G), jnp.float32)
    w_cat = w_cat.at[:T, 0:H].set(w_ih_t[:, 0:H])                       # W_ir
    w_cat = w_cat.at[:T, G:G + H].set(w_ih_t[:, H:2 * H])               # W_iz
    w_cat = w_cat.at[:T, 2 * G:2 * G + H].set(w_ih_t[:, 2 * H:3 * H])   # W_in
    w_cat = w_cat.at[T_pad:T_pad + H, 0:H].set(w_hh_t[:, 0:H])          # W_hr
    w_cat = w_cat.at[T_pad:T_pad + H, G:G + H].set(w_hh_t[:, H:2 * H])  # W_hz
    w_cat = w_cat.at[T_pad:T_pad + H, 3 * G:3 * G + H].set(w_hh_t[:, 2 * H:3 * H])  # W_hn

    b_cat = jnp.zeros((1, 4 * G), jnp.float32)
    b_cat = b_cat.at[0, 0:H].set(b_ih[0:H] + b_hh[0:H])
    b_cat = b_cat.at[0, G:G + H].set(b_ih[H:2 * H] + b_hh[H:2 * H])
    b_cat = b_cat.at[0, 2 * G:2 * G + H].set(b_ih[2 * H:3 * H])
    b_cat = b_cat.at[0, 3 * G:3 * G + H].set(b_hh[2 * H:3 * H])

    w_out_p = jnp.zeros((H_pad, O_pad), jnp.float32).at[:H, :O].set(w_out_t)
    b_out_p = jnp.full((1, O_pad), -1e30, jnp.float32).at[0, :O].set(b_out)

    return dict(w_cat=w_cat.astype(weight_dtype),
                b_cat=b_cat,
                w_out=w_out_p.astype(weight_dtype),
                b_out=b_out_p,
                dims=(T, H, O),
                pads=(T_pad, H_pad, O_pad, G))


# ---------------------------------------------------------------------------
# Pure-JAX references
# ---------------------------------------------------------------------------
_HI = jax.lax.Precision.HIGHEST


def _reference_f32(x_seq, hidden, params):
    """Exact PyTorch-semantics forward, f32 everywhere."""
    H = params["w_hh_t"].shape[0]
    T = params["w_ih_t"].shape[0]
    h = hidden.reshape(1, H).astype(jnp.float32)
    outs = []
    for t in range(x_seq.shape[0]):
        x = jnp.maximum(x_seq[t].reshape(1, T), 0.0)
        gi = jnp.dot(x, params["w_ih_t"], precision=_HI) + params["b_ih"]
        gh = jnp.dot(h, params["w_hh_t"], precision=_HI) + params["b_hh"]
        r = jax.nn.sigmoid(gi[:, :H] + gh[:, :H])
        z = jax.nn.sigmoid(gi[:, H:2 * H] + gh[:, H:2 * H])
        n = jnp.tanh(gi[:, 2 * H:] + r * gh[:, 2 * H:])
        h = (1.0 - z) * n + z * h
        logits = jnp.dot(h, params["w_out_t"], precision=_HI) + params["b_out"]
        outs.append(jax.nn.log_softmax(logits, axis=1))
    return jnp.concatenate(outs, axis=0), h.reshape(1, 1, H)


def _reference_quant(x_seq, hidden, params, wdt):
    """Mirrors the kernel's bf16-operand math for a tight numeric check."""
    H = params["w_hh_t"].shape[0]
    T = params["w_ih_t"].shape[0]
    rd = lambda a: a.astype(wdt).astype(jnp.float32)
    wi, wh, wo = rd(params["w_ih_t"]), rd(params["w_hh_t"]), rd(params["w_out_t"])
    h = hidden.reshape(1, H).astype(jnp.float32)
    outs = []
    for t in range(x_seq.shape[0]):
        x = jnp.maximum(x_seq[t].reshape(1, T), 0.0)
        gi = jnp.dot(rd(x), wi, precision=_HI) + params["b_ih"]
        gh = jnp.dot(rd(h), wh, precision=_HI) + params["b_hh"]
        r = jax.nn.sigmoid(gi[:, :H] + gh[:, :H])
        z = jax.nn.sigmoid(gi[:, H:2 * H] + gh[:, H:2 * H])
        n = jnp.tanh(gi[:, 2 * H:] + r * gh[:, 2 * H:])
        h = (1.0 - z) * n + z * h
        logits = jnp.dot(rd(h), wo, precision=_HI) + params["b_out"]
        outs.append(jax.nn.log_softmax(logits, axis=1))
    return jnp.concatenate(outs, axis=0), h.reshape(1, 1, H)


# ---------------------------------------------------------------------------
if __name__ == "__main__":
    TOTAL_TOKENS = 64   # stand-in for getTotalTokens()
    HIDDEN = 32
    OUTPUT = 48
    STEPS = 6

    key = jax.random.PRNGKey(0)
    k_in, k_h, k_p = jax.random.split(key, 3)

    params = init_params(k_p, TOTAL_TOKENS, HIDDEN, OUTPUT)
    packed = pack_params(params, weight_dtype=jnp.bfloat16)

    x_seq = jax.random.normal(k_in, (STEPS, TOTAL_TOKENS), jnp.float32)
    hidden0 = jax.random.normal(k_h, (1, 1, HIDDEN), jnp.float32)

    # Fused multi-step decode: one pallas_call for all STEPS.
    log_probs, h_final = decoder_rnn_forward_seq(x_seq, hidden0, packed)
    jax.block_until_ready((log_probs, h_final))

    # Single-step call == the literal module forward().
    lp1, h1 = decoder_rnn_forward(x_seq[0], hidden0, packed)
    jax.block_until_ready((lp1, h1))

    assert log_probs.shape == (STEPS, OUTPUT)
    assert h_final.shape == (1, 1, HIDDEN)
    assert lp1.shape == (1, OUTPUT) and h1.shape == (1, 1, HIDDEN)
    assert bool(jnp.isfinite(log_probs).all())

    # Tight check vs. a reference using the same bf16-rounded operands
    # (validates packing, gate order, padding and the fused matmul).
    q_lp, q_h = _reference_quant(x_seq, hidden0, params, jnp.bfloat16)
    assert jnp.allclose(log_probs, q_lp, atol=2e-3, rtol=0), \
        float(jnp.max(jnp.abs(log_probs - q_lp)))
    assert jnp.allclose(h_final, q_h, atol=2e-3, rtol=0)

    # Sanity check vs. the full-f32 PyTorch-semantics reference
    # (difference is only bf16 weight/operand rounding).
    f_lp, f_h = _reference_f32(x_seq, hidden0, params)
    assert jnp.allclose(log_probs, f_lp, atol=5e-2, rtol=0)
    assert jnp.allclose(h_final, f_h, atol=3e-2, rtol=0)
    assert jnp.allclose(lp1, f_lp[:1], atol=5e-2, rtol=0)

    print("KERNEL_OK")
</pallas_src>

<mosaic_0001>
module attributes {stable_mosaic.version = 11 : i64} {
  func.func @_decoder_steps_kernel(%arg0: i32, %arg1: memref<1x1x128xf32, #tpu.memory_space<vmem>>, %arg2: memref<1x128xf32, #tpu.memory_space<vmem>>, %arg3: memref<256x512xbf16, #tpu.memory_space<vmem>>, %arg4: memref<1x512xf32, #tpu.memory_space<vmem>>, %arg5: memref<128x128xbf16, #tpu.memory_space<vmem>>, %arg6: memref<1x128xf32, #tpu.memory_space<vmem>>, %arg7: memref<1x1x128xf32, #tpu.memory_space<vmem>>, %arg8: memref<1x128xf32, #tpu.memory_space<vmem>>, %arg9: memref<1x128xf32, #tpu.memory_space<vmem>>) attributes {dimension_semantics = [#tpu.dimension_semantics<arbitrary>], iteration_bounds = array<i64: 6>, scalar_prefetch = 0 : i64, scratch_operands = 1 : i64, tpu.core_type = #tpu.core_type<tc>, window_params = [{transform_indices = @transform_0, window_bounds = array<i64: 1, 1, 128>}, {pipeline_mode = #tpu.pipeline_mode<synchronous>, transform_indices = @transform_1, window_bounds = array<i64: 1, 128>}, {pipeline_mode = #tpu.pipeline_mode<synchronous>, transform_indices = @transform_2, window_bounds = array<i64: 256, 512>}, {pipeline_mode = #tpu.pipeline_mode<synchronous>, transform_indices = @transform_3, window_bounds = array<i64: 1, 512>}, {pipeline_mode = #tpu.pipeline_mode<synchronous>, transform_indices = @transform_4, window_bounds = array<i64: 128, 128>}, {pipeline_mode = #tpu.pipeline_mode<synchronous>, transform_indices = @transform_5, window_bounds = array<i64: 1, 128>}, {transform_indices = @transform_6, window_bounds = array<i64: 1, 1, 128>}, {pipeline_mode = #tpu.pipeline_mode<synchronous>, transform_indices = @transform_7, window_bounds = array<i64: 1, 128>}]} {
    %c0_i32 = arith.constant 0 : i32
    %0 = arith.cmpi eq, %arg0, %c0_i32 : i32
    %1 = arith.extui %0 : i1 to i32
    %c0_i32_0 = arith.constant 0 : i32
    %2 = arith.cmpi ne, %1, %c0_i32_0 : i32
    scf.if %2 {
      %c0_27 = arith.constant 0 : index
      %c0_28 = arith.constant 0 : index
      %56 = vector.load %arg2[%c0_27, %c0_28] : memref<1x128xf32, #tpu.memory_space<vmem>>, vector<1x128xf32>
      %c0_29 = arith.constant 0 : index
      %c0_30 = arith.constant 0 : index
      %57 = vector.load %arg9[%c0_29, %c0_30] : memref<1x128xf32, #tpu.memory_space<vmem>>, vector<1x128xf32>
      tpu.vector_store %arg9[%c0_29, %c0_30], %56 {strides = array<i32>} : memref<1x128xf32, #tpu.memory_space<vmem>>, vector<1x128xf32>,
    } else {
    }
    %c0 = arith.constant 0 : index
    %c0_1 = arith.constant 0 : index
    %c0_2 = arith.constant 0 : index
    %3 = vector.load %arg1[%c0, %c0_1, %c0_2] : memref<1x1x128xf32, #tpu.memory_space<vmem>>, vector<1x1x128xf32>
    %4 = vector.shape_cast %3 : vector<1x1x128xf32> to vector<1x128xf32>
    %cst = arith.constant 0.000000e+00 : f32
    %5 = vector.broadcast %cst : f32 to vector<1x128xf32>
    %6 = arith.maximumf %4, %5 : vector<1x128xf32>
    %c0_3 = arith.constant 0 : index
    %c0_4 = arith.constant 0 : index
    %7 = vector.load %arg9[%c0_3, %c0_4] : memref<1x128xf32, #tpu.memory_space<vmem>>, vector<1x128xf32>
    %8 = tpu.concatenate %6, %7 in 1 : vector<1x128xf32>, vector<1x128xf32> -> vector<1x256xf32>
    %9 = arith.truncf %8 : vector<1x256xf32> to vector<1x256xbf16>
    %c0_5 = arith.constant 0 : index
    %c0_6 = arith.constant 0 : index
    %10 = vector.load %arg3[%c0_5, %c0_6] : memref<256x512xbf16, #tpu.memory_space<vmem>>, vector<256x512xbf16>
    %cst_7 = arith.constant dense<0.000000e+00> : vector<1x512xf32>
    %11 = tpu.matmul %9, %10, %cst_7 {dimension_numbers = #tpu.dot_dimension_numbers<[1], [0], [0], [1], [0, 0, 1, 1], [], []>} : vector<1x256xbf16>, vector<256x512xbf16>, vector<1x512xf32> -> vector<1x512xf32>
    %c0_8 = arith.constant 0 : index
    %c0_9 = arith.constant 0 : index
    %12 = vector.load %arg4[%c0_8, %c0_9] : memref<1x512xf32, #tpu.memory_space<vmem>>, vector<1x512xf32>
    %13 = arith.addf %11, %12 : vector<1x512xf32>
    %14 = vector.extract_strided_slice %13 {offsets = [0, 0], sizes = [1, 128], strides = [1, 1]} : vector<1x512xf32> to vector<1x128xf32>
    %15 = arith.negf %14 : vector<1x128xf32>
    %16 = math.exp %15 : vector<1x128xf32>
    %cst_10 = arith.constant 1.000000e+00 : f32
    %17 = vector.broadcast %cst_10 : f32 to vector<1x128xf32>
    %18 = arith.addf %17, %16 : vector<1x128xf32>
    %19 = arith.divf %17, %18 : vector<1x128xf32>
    %20 = vector.extract_strided_slice %13 {offsets = [0, 128], sizes = [1, 128], strides = [1, 1]} : vector<1x512xf32> to vector<1x128xf32>
    %21 = arith.negf %20 : vector<1x128xf32>
    %22 = math.exp %21 : vector<1x128xf32>
    %cst_11 = arith.constant 1.000000e+00 : f32
    %23 = vector.broadcast %cst_11 : f32 to vector<1x128xf32>
    %24 = arith.addf %23, %22 : vector<1x128xf32>
    %25 = arith.divf %23, %24 : vector<1x128xf32>
    %26 = vector.extract_strided_slice %13 {offsets = [0, 256], sizes = [1, 128], strides = [1, 1]} : vector<1x512xf32> to vector<1x128xf32>
    %27 = vector.extract_strided_slice %13 {offsets = [0, 384], sizes = [1, 128], strides = [1, 1]} : vector<1x512xf32> to vector<1x128xf32>
    %28 = arith.mulf %19, %27 : vector<1x128xf32>
    %29 = arith.addf %26, %28 : vector<1x128xf32>
    %30 = math.tanh %29 : vector<1x128xf32>
    %cst_12 = arith.constant 1.000000e+00 : f32
    %31 = vector.broadcast %cst_12 : f32 to vector<1x128xf32>
    %32 = arith.subf %31, %25 : vector<1x128xf32>
    %33 = arith.mulf %32, %30 : vector<1x128xf32>
    %34 = arith.mulf %25, %7 : vector<1x128xf32>
    %35 = arith.addf %33, %34 : vector<1x128xf32>
    %c0_13 = arith.constant 0 : index
    %c0_14 = arith.constant 0 : index
    %36 = vector.load %arg9[%c0_13, %c0_14] : memref<1x128xf32, #tpu.memory_space<vmem>>, vector<1x128xf32>
    tpu.vector_store %arg9[%c0_13, %c0_14], %35 {strides = array<i32>} : memref<1x128xf32, #tpu.memory_space<vmem>>, vector<1x128xf32>,
    %c0_15 = arith.constant 0 : index
    %c0_16 = arith.constant 0 : index
    %37 = vector.load %arg8[%c0_15, %c0_16] : memref<1x128xf32, #tpu.memory_space<vmem>>, vector<1x128xf32>
    tpu.vector_store %arg8[%c0_15, %c0_16], %35 {strides = array<i32>} : memref<1x128xf32, #tpu.memory_space<vmem>>, vector<1x128xf32>,
    %38 = arith.truncf %35 : vector<1x128xf32> to vector<1x128xbf16>
    %c0_17 = arith.constant 0 : index
    %c0_18 = arith.constant 0 : index
    %39 = vector.load %arg5[%c0_17, %c0_18] : memref<128x128xbf16, #tpu.memory_space<vmem>>, vector<128x128xbf16>
    %cst_19 = arith.constant dense<0.000000e+00> : vector<1x128xf32>
    %40 = tpu.matmul %38, %39, %cst_19 {dimension_numbers = #tpu.dot_dimension_numbers<[1], [0], [0], [1], [0, 0, 1, 1], [], []>} : vector<1x128xbf16>, vector<128x128xbf16>, vector<1x128xf32> -> vector<1x128xf32>
    %c0_20 = arith.constant 0 : index
    %c0_21 = arith.constant 0 : index
    %41 = vector.load %arg6[%c0_20, %c0_21] : memref<1x128xf32, #tpu.memory_space<vmem>>, vector<1x128xf32>
    %42 = arith.addf %40, %41 : vector<1x128xf32>
    %cst_22 = arith.constant dense<0xFF800000> : vector<1xf32>
    %43 = vector.multi_reduction <maximumf>, %42, %cst_22 [1] : vector<1x128xf32> to vector<1xf32>
    %44 = vector.shape_cast %43 : vector<1xf32> to vector<1x1xf32>
    %45 = vector.broadcast %44 : vector<1x1xf32> to vector<1x128xf32>
    %46 = arith.subf %42, %45 : vector<1x128xf32>
    %47 = math.exp %46 : vector<1x128xf32>
    %cst_23 = arith.constant dense<0.000000e+00> : vector<1xf32>
    %48 = vector.multi_reduction <add>, %47, %cst_23 [1] : vector<1x128xf32> to vector<1xf32>
    %49 = vector.shape_cast %48 : vector<1xf32> to vector<1x1xf32>
    %50 = math.log %49 : vector<1x1xf32>
    %51 = vector.broadcast %50 : vector<1x1xf32> to vector<1x128xf32>
    %52 = arith.subf %46, %51 : vector<1x128xf32>
    %c0_24 = arith.constant 0 : index
    %c0_25 = arith.constant 0 : index
    %c0_26 = arith.constant 0 : index
    %53 = vector.load %arg7[%c0_24, %c0_25, %c0_26] : memref<1x1x128xf32, #tpu.memory_space<vmem>>, vector<1x1x128xf32>
    %54 = vector.shape_cast %53 : vector<1x1x128xf32> to vector<1x128xf32>
    %55 = vector.shape_cast %52 : vector<1x128xf32> to vector<1x1x128xf32>
    tpu.vector_store %arg7[%c0_24, %c0_25, %c0_26], %55 {strides = array<i32>} : memref<1x1x128xf32, #tpu.memory_space<vmem>>, vector<1x1x128xf32>,
    return
  }
  func.func @transform_0(%arg0: i32) -> (i32, i32, i32) {
    %c0_i32 = arith.constant 0 : i32
    %c0_i32_0 = arith.constant 0 : i32
    %c0_i32_1 = arith.constant 0 : i32
    return %arg0, %c0_i32, %c0_i32_0 : i32, i32, i32
  }
  func.func @transform_1(%arg0: i32) -> (i32, i32) {
    %c0_i32 = arith.constant 0 : i32
    %c0_i32_0 = arith.constant 0 : i32
    %c0_i32_1 = arith.constant 0 : i32
    return %c0_i32, %c0_i32_0 : i32, i32
  }
  func.func @transform_2(%arg0: i32) -> (i32, i32) {
    %c0_i32 = arith.constant 0 : i32
    %c0_i32_0 = arith.constant 0 : i32
    %c0_i32_1 = arith.constant 0 : i32
    return %c0_i32, %c0_i32_0 : i32, i32
  }
  func.func @transform_3(%arg0: i32) -> (i32, i32) {
    %c0_i32 = arith.constant 0 : i32
    %c0_i32_0 = arith.constant 0 : i32
    %c0_i32_1 = arith.constant 0 : i32
    return %c0_i32, %c0_i32_0 : i32, i32
  }
  func.func @transform_4(%arg0: i32) -> (i32, i32) {
    %c0_i32 = arith.constant 0 : i32
    %c0_i32_0 = arith.constant 0 : i32
    %c0_i32_1 = arith.constant 0 : i32
    return %c0_i32, %c0_i32_0 : i32, i32
  }
  func.func @transform_5(%arg0: i32) -> (i32, i32) {
    %c0_i32 = arith.constant 0 : i32
    %c0_i32_0 = arith.constant 0 : i32
    %c0_i32_1 = arith.constant 0 : i32
    return %c0_i32, %c0_i32_0 : i32, i32
  }
  func.func @transform_6(%arg0: i32) -> (i32, i32, i32) {
    %c0_i32 = arith.constant 0 : i32
    %c0_i32_0 = arith.constant 0 : i32
    %c0_i32_1 = arith.constant 0 : i32
    return %arg0, %c0_i32, %c0_i32_0 : i32, i32, i32
  }
  func.func @transform_7(%arg0: i32) -> (i32, i32) {
    %c0_i32 = arith.constant 0 : i32
    %c0_i32_0 = arith.constant 0 : i32
    %c0_i32_1 = arith.constant 0 : i32
    return %c0_i32, %c0_i32_0 : i32, i32
  }
}

</mosaic_0001>

<bundles_post_ra>
// kernel: tpu_custom_call.1
= control target key start
LH: loop header
LB: loop body
LE: loop exit
PB: predicated region body
PF: predicated region fallthrough
CT: control target
= control target key end

     0   :  { %s1819_s0 = inlined_call_operand.hbm [shape: f32[6,1,128], index: 0, kind: input, shape index: {}]   ;;  %s1820_s1 = inlined_call_operand.vmem [shape: f32[1,128], index: 1, kind: input, shape index: {}]   ;;  %s1821_s2 = inlined_call_operand.hbm [shape: bf16[256,512], index: 2, kind: input, shape index: {}]   ;;  %s1822_s3 = inlined_call_operand.vmem [shape: f32[1,512], index: 3, kind: input, shape index: {}]   ;;  %s1823_s4 = inlined_call_operand.hbm [shape: bf16[128,128], index: 4, kind: input, shape index: {}]   ;;  %s1824_s5 = inlined_call_operand.vmem [shape: f32[1,128], index: 5, kind: input, shape index: {}]   ;;  %s1825_s6 = inlined_call_operand.hbm [shape: f32[6,1,128], index: 6, kind: output, shape index: {0}]   ;;  %s1826_s7 = inlined_call_operand.hbm [shape: f32[1,128], index: 7, kind: output, shape index: {1}]  }
   0x1   :  { %1831 = sst [smem:[#allocation16_spill]] %s1821_s2 }
   0x2   :  { %1832 = sst [smem:[#allocation17_spill]] %s1823_s4 }
   0x3   :  { %13 = vsyncpa [#allocation4], 0 }
   0x4   :  { %15 = vsyncpa [#allocation4 + $0x1], 0 }
   0x5   :  { %16 = vsyncpa [#allocation7], 0 }
   0x6   :  { %17 = vsyncpa [#allocation5], 0 }
   0x7   :  { %19 = vsyncpa [#allocation5 + $0x1], 0 }
   0x8   :  { %20 = vsyncpa [#allocation11], 0  ;;  %s1621_s24 = smov 0   ;;  %s1623_s25 = smov 0  }
   0x9   :  { %s1625_s26 = smov 0   ;;  %s1627_s27 = smov 0  }
   0xa LB: > { %s1642_s28 = sadd.s32 4294967295, %s1568_s27   ;;  %s1076_s29 = sadd.s32 4294967294, %s1568_s27   ;;  %s1568_s27 = sphi %s1627_s27, %s1856_s27   ;;  %s1564_s26 = sphi %s1625_s26, %s1855_s26   ;;  %s1560_s25 = sphi %s1623_s25, %s1854_s25   ;;  %s1556_s24 = sphi %s1621_s24, %s1853_s24  }
   0xb   : > { %p46_p0 = scmp.ne.s32.totalorder %s1560_s25, %s1556_s24  ;;  %p1827_p1 = scmp.eq.s32.totalorder %s1642_s28, 0 }
   0xc   : > { %p181_p3 = scmp.eq.s32.totalorder %s1076_s29, 5  ;;  %p1077_p5 = scmp.ge.s32.totalorder %s1568_s27, 1 }
   0xd   : > { %p1651_p4 = por %p1827_p1, %p46_p0  ;;  %p209_p7 = scmp.lt.s32.totalorder %s1568_s27, 7 }
   0xe   : > { %p1656_p6 = por %p181_p3, %p46_p0  ;;  %s1570_s10 = smov [#allocation6]  }
   0xf   : > { %s1833_s30 = scalar_select %p1651_p4, 1, 0 }
  0x10   : > { %s1834_s8 = scalar_select %p1656_p6, 1, 0 }
  0x11   : > { %p1662_p9 = pnand %p1077_p5, %p209_p7  ;;  %s224_s11 = sshll.u32 %s1570_s10, 4  ;;  %s225_s11 = int_to_ptr.vmem [resolvable:$true] %s224_s11 }
  0x12   : > { %s1571_s13 = smov [#allocation8]   ;;  %s1403_s15 = scalar_lea.vmem %s225_s11, 8192 }
  0x13   : > { %s1835_s9 = scalar_select %p1662_p9, 1, 0 }
  0x14   : > { %p1210_p10 = pneg %p1662_p9  ;;  %s240_s14 = sshll.u32 %s1571_s13, 4  ;;  %s241_s14 = int_to_ptr.vmem [resolvable:$true] %s240_s14 }
  0x15   : > { %p1404_p13 = scmp.ne.s32.totalorder %s225_s11, %s1403_s15  ;;  %p1411_p5 = scmp.lt.s32.totalorder %s225_s11, %s225_s11 }
  0x16   : > { %p1670_p11 = pnand %p1210_p10, %p1827_p1  ;;  %p1412_p7 = scmp.lt.s32.totalorder %s1403_s15, %s1403_s15 }
  0x18   : > { %p1394_p12 = pneg %p1670_p11  ;;  %p1413_p8 = por %p1412_p7, %p1411_p5 }
  0x1a   : > { %p1406_p0 = pnand %p1404_p13, %p1394_p12 }
  0x1c   : > { %p1407_p3 = pneg %p1406_p0 }
  0x1e   : > { %p1414_p10 = pnand %p1413_p8, %p1407_p3 }
  0x20   : > { %1417 = shalt.err (!%p1414_p10)
}
  0x21   : > { %s1572_s16 = smov 256   ;;  %s1573_s17 = smov 16  }
  0x22   : > { %s1837_s2 = sld [smem:[#allocation16_spill]]  ;;  %s1429_s20 = scalar_lea.vmem %s241_s14, 1024 }
  0x23   : > { %p1430_p1 = scmp.ne.s32.totalorder %s241_s14, %s1429_s20  ;;  %p1437_p2 = scmp.lt.s32.totalorder %s241_s14, %s241_s14 }
  0x24   : > { %p1438_p6 = scmp.lt.s32.totalorder %s1429_s20, %s1429_s20 }
  0x25   : > { %p1432_p13 = pnand %p1430_p1, %p1394_p12 }
  0x26   : > { %p1439_p5 = por %p1438_p6, %p1437_p2 }
  0x27   : > { %p1433_p0 = pneg %p1432_p13 }
  0x28   : > { %1213 = dma.hbm_to_vmem [thread:$0]  (!%p1670_p11), %s1837_s2, 8192, %s225_s11, [#allocation7], %s1572_s16, %s1572_s16, %s1573_s17  }
  0x29   : > { %p1440_p8 = pnand %p1439_p5, %p1433_p0 }
  0x2b   : > { %1443 = shalt.err (!%p1440_p8)
}
  0x2c   : > { %s1574_s21 = smov 64   ;;  %s1575_s22 = smov 4  }
  0x2d   : > { %s1838_s4 = sld [smem:[#allocation17_spill]]  ;;  %s1693_s10 = sadd.s32 1, %s1568_s27  }
  0x2e   : > { %s30_s11 = ssub.s32 %s1568_s27, %s1693_s10  ;;  %s33_s13 = sadd.s32 1, %s1564_s26 }
  0x2f   : > { %p31_p1 = scmp.eq.s32.totalorder %s30_s11, 0  ;;  %p40_p2 = scmp.ne.s32.totalorder %s1564_s26, %s1560_s25 }
  0x30   : > { %p41_p6 = scmp.eq.s32.totalorder %s1568_s27, 0  ;;  %p1839_p3 = scmp.eq.s32.totalorder %s1642_s28, 5 }
  0x31   : > { %s1702_s15 = scalar_select %p31_p1, %s1564_s26, %s33_s13  }
  0x32   : > { %p42_p12 = por %p41_p6, %p40_p2  ;;  %p1706_p7 = por %p1839_p3, %p40_p2 }
  0x33   : > { %1216 = dma.hbm_to_vmem [thread:$0]  (!%p1670_p11), %s1838_s4, 1024, %s241_s14, [#allocation7], %s1574_s21, %s1574_s21, %s1575_s22  }
  0x34   : > { %s1840_s16 = scalar_select %p1706_p7, 1, 0 }
  0x35   : > { %p1227_p10 = scmp.lt.s32.totalorder %s1568_s27, 6  ;;  %s257_s12 = sand.u32 1, %s1564_s26  }
  0x36   : > { %s1081_s17 = sshll.u32 %s1568_s27, 4  ;;  %s260_s14 = scalar_lea.vmem [#allocation3], %s257_s12 }
  0x37   : > { %s267_s18 = sshll.u32 %s260_s14, 4  ;;  %s1716_s21 = scalar_lea.hbm %s1819_s0, %s1081_s17  ;;  %s268_s18 = int_to_ptr.vmem [resolvable:$true] %s267_s18 }
  0x38   : > { %p1718_p11 = pnand %p1227_p10, %p42_p12  ;;  %s258_s23 = scalar_lea.sflag [#allocation4], %s257_s12 }
  0x39   : > { %s1444_s29 = scalar_lea.hbm %s1716_s21, 16  ;;  %s1449_s17 = scalar_lea.hbm %s1819_s0, 96 }
  0x3a   : > { %p1445_p13 = scmp.ne.s32.totalorder %s1716_s21, %s1444_s29  ;;  %p1446_p0 = pneg %p1718_p11 }
  0x3b   : > { %p1450_p1 = scmp.lt.s32.totalorder %s1716_s21, %s1819_s0  ;;  %p1451_p2 = scmp.lt.s32.totalorder %s1449_s17, %s1444_s29 }
  0x3c   : > { %p1447_p5 = pnand %p1446_p0, %p1445_p13 }
  0x3d   : > { %p1452_p6 = por %p1451_p2, %p1450_p1 }
  0x3e   : > { %p1448_p8 = pneg %p1447_p5 }
  0x40   : > { %p1453_p12 = pnand %p1452_p6, %p1448_p8 }
  0x42   : > { %1456 = shalt.err (!%p1453_p12)
}
  0x43   : > { %s1457_s20 = scalar_lea.vmem %s268_s18, 16  ;;  %s1576_s12 = smov [#allocation3]  }
  0x44   : > { %p1458_p3 = scmp.ne.s32.totalorder %s268_s18, %s1457_s20  ;;  %s1462_s2 = sshll.u32 %s1576_s12, 4  ;;  %s1463_s2 = int_to_ptr.vmem [resolvable:$false] %s1462_s2 }
  0x45   : > { %s1464_s4 = scalar_lea.vmem %s1463_s2, 32  ;;  %p1465_p13 = scmp.lt.s32.totalorder %s268_s18, %s1463_s2 }
  0x46   : > { %p1460_p10 = pnand %p1458_p3, %p1446_p0  ;;  %p1466_p5 = scmp.lt.s32.totalorder %s1464_s4, %s1457_s20 }
  0x48   : > { %p1461_p7 = pneg %p1460_p10  ;;  %p1467_p4 = por %p1466_p5, %p1465_p13 }
  0x4a   : > { %p1468_p9 = pnand %p1467_p4, %p1461_p7 }
  0x4c   : > { %1471 = shalt.err (!%p1468_p9)
}
  0x4d   : > { %1220 = dma.hbm_to_vmem [thread:$0]  (!%p1718_p11), %s1716_s21, 16, %s268_s18, %s258_s23  }
  0x4e   : > { %p1842_p8 = scmp.ne.s32.totalorder %s1835_s9, 0 }
  0x4f   : > { %s1739_s29 = sand.u32 (!%p1842_p8), 1, %s1560_s25   ;;  %p1843_p0 = scmp.ne.s32.totalorder (!%p1842_p8), %s1833_s30, 0 }
  0x50   : > { %276 = sbr.rel (%p1842_p8) target bundleno = 941 (0x3ad), region = 44  ;;  %s279_s11 = scalar_lea.sflag (!%p1842_p8), [#allocation4], %s1739_s29 }
  0x51   : > { %s281_s13 = scalar_lea.vmem (!%p1842_p8), [#allocation3], %s1739_s29 }
  0x55   : > { %1539 = dma.done.wait (%p1843_p0), %s279_s11, 16  }
  0x56   : > { %1541 = vsyncadd (%p1843_p0), %s279_s11, 4294967280  ;;  %p1844_p4 = scmp.eq.s32.totalorder %s1642_s28, 0 }
  0x58   : > { %1543 = dma.done.wait (%p1844_p4), [#allocation7], 9216   ;;  %p1845_p9 = pmov %p1844_p4 }
  0x59   : > { %s315_s2 = scalar_lea.vmem [#allocation9], %s1739_s29  ;;  %p1846_p7 = scmp.ne.s32.totalorder %s1642_s28, 0 }
  0x5a   : > { %1545 = vsyncadd (%p1845_p9), [#allocation7], 4294958080 }
  0x5b   : > { %322 = sbr.rel (%p1846_p7) target bundleno = 98 (0x62), region = 60 }
  0x60   : > { %v323_v0 = vld [vmem:[%s1820_s1] sm:$0x1] }
  0x61   : > { %324 = vst [vmem:[#allocation2] sm:$0x1] %v323_v0 }
  0x62 PF: > { %v1274_v1 = vld [vmem:[#allocation6 + $0xe4] ss:$16 sps:$4 sm:$0xff]   ;;  %v1276_v2 = vld [vmem:[#allocation6 + $0xe0] ss:$16 sps:$4 sm:$0xff]   ;;  %v1294_v8 = vld [vmem:[#allocation6 + $0xec] ss:$16 sps:$4 sm:$0xff]  }
  0x63   : > { %736 = vmatprep.subr.bf16.mxu0 %v1274_v1  ;;  %v1277_v3 = vld [vmem:[#allocation6 + $0xc4] ss:$16 sps:$4 sm:$0xff]   ;;  %v1279_v4 = vld [vmem:[#allocation6 + $0xc0] ss:$16 sps:$4 sm:$0xff]   ;;  %v1297_v9 = vld [vmem:[#allocation6 + $0xe8] ss:$16 sps:$4 sm:$0xff]   ;;  %777 = vmatprep.subr.bf16.mxu1 %v1294_v8 }
  0x64   : > { %737 = vmatpush1.bf16.msra.mxu0 %v1276_v2  ;;  %v1280_v5 = vld [vmem:[#allocation6 + $0xa4] ss:$16 sps:$4 sm:$0xff]   ;;  %v1282_v6 = vld [vmem:[#allocation6 + $0xa0] ss:$16 sps:$4 sm:$0xff]   ;;  %778 = vmatpush1.bf16.msra.mxu1 %v1297_v9  ;;  %v1300_v12 = vld [vmem:[#allocation6 + $0xcc] ss:$16 sps:$4 sm:$0xff]  }
  0x65   : > { %738 = vmatprep.subr.bf16.mxu0 %v1277_v3  ;;  %v1283_v7 = vld [vmem:[#allocation6 + $0x84] ss:$16 sps:$4 sm:$0xff]   ;;  %v1285_v10 = vld [vmem:[#allocation6 + $0x80] ss:$16 sps:$4 sm:$0xff]   ;;  %v1303_v13 = vld [vmem:[#allocation6 + $0xc8] ss:$16 sps:$4 sm:$0xff]   ;;  %779 = vmatprep.subr.bf16.mxu1 %v1300_v12 }
  0x66   : > { %v1286_v11 = vld [vmem:[#allocation6 + $0x64] ss:$16 sps:$4 sm:$0xff]   ;;  %v1288_v14 = vld [vmem:[#allocation6 + $0x60] ss:$16 sps:$4 sm:$0xff]   ;;  %v1306_v16 = vld [vmem:[#allocation6 + $0xac] ss:$16 sps:$4 sm:$0xff]  }
  0x67   : > { %v1289_v15 = vld [vmem:[#allocation6 + $0x44] ss:$16 sps:$4 sm:$0xff]   ;;  %v1309_v17 = vld [vmem:[#allocation6 + $0xa8] ss:$16 sps:$4 sm:$0xff]   ;;  %v1312_v18 = vld [vmem:[#allocation6 + $0x8c] ss:$16 sps:$4 sm:$0xff]  }
  0x68   : > { %739 = vmatpush1.bf16.msra.mxu0 %v1279_v4  ;;  %780 = vmatpush1.bf16.msra.mxu1 %v1303_v13  ;;  %v1291_v19 = vld [vmem:[#allocation6 + $0x40] ss:$16 sps:$4 sm:$0xff]   ;;  %v1292_v20 = vld [vmem:[#allocation6 + $0x24] ss:$16 sps:$4 sm:$0xff]   ;;  %v1315_v21 = vld [vmem:[#allocation6 + $0x88] ss:$16 sps:$4 sm:$0xff]  }
  0x69   : > { %740 = vmatprep.subr.bf16.mxu0 %v1280_v5  ;;  %781 = vmatprep.subr.bf16.mxu1 %v1306_v16  ;;  %v1318_v22 = vld [vmem:[#allocation6 + $0x6c] ss:$16 sps:$4 sm:$0xff]   ;;  %v1296_v23 = vld [vmem:[#allocation6 + $0x20] ss:$16 sps:$4 sm:$0xff]   ;;  %v1298_v24 = vld [vmem:[#allocation6 + $0x4] ss:$16 sps:$4 sm:$0xff]  }
  0x6a   : > { %v1321_v25 = vld [vmem:[#allocation6 + $0x68] ss:$16 sps:$4 sm:$0xff]   ;;  %v1324_v26 = vld [vmem:[#allocation6 + $0x4c] ss:$16 sps:$4 sm:$0xff]   ;;  %v1302_v27 = vld [vmem:[#allocation6] ss:$16 sps:$4 sm:$0xff]  }
  0x6b   : > { %v1304_v28 = vld [vmem:[#allocation6 + $0x1e4] ss:$16 sps:$4 sm:$0xff]   ;;  %v1327_v29 = vld [vmem:[#allocation6 + $0x48] ss:$16 sps:$4 sm:$0xff]   ;;  %v1330_v30 = vld [vmem:[#allocation6 + $0x2c] ss:$16 sps:$4 sm:$0xff]  }
  0x6c   : > { %741 = vmatpush1.bf16.msra.mxu0 %v1282_v6  ;;  %782 = vmatpush1.bf16.msra.mxu1 %v1309_v17  ;;  %v1308_v31 = vld [vmem:[#allocation6 + $0x1e0] ss:$16 sps:$4 sm:$0xff]   ;;  %v1310_v32 = vld [vmem:[#allocation6 + $0x1c4] ss:$16 sps:$4 sm:$0xff]   ;;  %v1333_v33 = vld [vmem:[#allocation6 + $0x28] ss:$16 sps:$4 sm:$0xff]  }
  0x6d   : > { %742 = vmatprep.subr.bf16.mxu0 %v1283_v7  ;;  %783 = vmatprep.subr.bf16.mxu1 %v1312_v18  ;;  %v1336_v34 = vld [vmem:[#allocation6 + $0xc] ss:$16 sps:$4 sm:$0xff]   ;;  %v1314_v36 = vld [vmem:[#allocation6 + $0x1c0] ss:$16 sps:$4 sm:$0xff]   ;;  %v1316_v38 = vld [vmem:[#allocation6 + $0x1a4] ss:$16 sps:$4 sm:$0xff]  }
  0x6e   : > { %v1757_v35 = vld [vmem:[#allocation2] sm:$0x1]  ;;  %v1339_v39 = vld [vmem:[#allocation6 + $0x8] ss:$16 sps:$4 sm:$0xff]   ;;  %v1320_v41 = vld [vmem:[#allocation6 + $0x1a0] ss:$16 sps:$4 sm:$0xff]  }
  0x6f   : > { %v329_v37 = vpack.c.bf16 %v1757_v35, %v1757_v35  ;;  %v1342_v40 = vld [vmem:[#allocation6 + $0x1ec] ss:$16 sps:$4 sm:$0xff]   ;;  %v1322_v42 = vld [vmem:[#allocation6 + $0x184] ss:$16 sps:$4 sm:$0xff]   ;;  %v1345_v43 = vld [vmem:[#allocation6 + $0x1e8] ss:$16 sps:$4 sm:$0xff]  }
  0x70   : > { %743 = vmatpush1.bf16.msra.mxu0 %v1285_v10  ;;  %784 = vmatpush1.bf16.msra.mxu1 %v1315_v21  ;;  %v1326_v44 = vld [vmem:[#allocation6 + $0x180] ss:$16 sps:$4 sm:$0xff]   ;;  %v1348_v45 = vld [vmem:[#allocation6 + $0x1cc] ss:$16 sps:$4 sm:$0xff]   ;;  %v1328_v46 = vld [vmem:[#allocation6 + $0x164] ss:$16 sps:$4 sm:$0xff]  }
  0x71   : > { %744 = vmatprep.subr.bf16.mxu0 %v1286_v11  ;;  %785 = vmatprep.subr.bf16.mxu1 %v1318_v22  ;;  %v1351_v47 = vld [vmem:[#allocation6 + $0x1c8] ss:$16 sps:$4 sm:$0xff]   ;;  %v1352_v48 = vld [vmem:[#allocation6 + $0x1ac] ss:$16 sps:$4 sm:$0xff]   ;;  %v1332_v49 = vld [vmem:[#allocation6 + $0x160] ss:$16 sps:$4 sm:$0xff]  }
  0x72   : > { %768 = vmatprep.mubr.bf16.mxu0 %v329_v37  ;;  %809 = vmatprep.mubr.bf16.mxu1 %v329_v37  ;;  %v1334_v50 = vld [vmem:[#allocation6 + $0x144] ss:$16 sps:$4 sm:$0xff]   ;;  %v1354_v51 = vld [vmem:[#allocation6 + $0x1a8] ss:$16 sps:$4 sm:$0xff]   ;;  %v1355_v52 = vld [vmem:[#allocation6 + $0x18c] ss:$16 sps:$4 sm:$0xff]  }
  0x73   : > { %v1338_v53 = vld [vmem:[#allocation6 + $0x140] ss:$16 sps:$4 sm:$0xff]   ;;  %v1340_v54 = vld [vmem:[#allocation6 + $0x124] ss:$16 sps:$4 sm:$0xff]   ;;  %v1357_v55 = vld [vmem:[#allocation6 + $0x188] ss:$16 sps:$4 sm:$0xff]  }
  0x74   : > { %745 = vmatpush1.bf16.msra.mxu0 %v1288_v14  ;;  %786 = vmatpush1.bf16.msra.mxu1 %v1321_v25  ;;  %v1358_v56 = vld [vmem:[#allocation6 + $0x16c] ss:$16 sps:$4 sm:$0xff]   ;;  %v1344_v57 = vld [vmem:[#allocation6 + $0x120] ss:$16 sps:$4 sm:$0xff]   ;;  %v1346_v59 = vld [vmem:[#allocation6 + $0x104] ss:$16 sps:$4 sm:$0xff]  }
  0x75   : > { %746 = vmatprep.subr.bf16.mxu0 %v1289_v15  ;;  %787 = vmatprep.subr.bf16.mxu1 %v1324_v26  ;;  %v325_v58 = vld [vmem:[%s281_s13] sm:$0x1]  ;;  %v1360_v60 = vld [vmem:[#allocation6 + $0x168] ss:$16 sps:$4 sm:$0xff]   ;;  %v1350_v63 = vld [vmem:[#allocation6 + $0x100] ss:$16 sps:$4 sm:$0xff]   ;;  %v716_v15 = vlaneseq }
  0x76   : > { %v1361_v61 = vld [vmem:[#allocation6 + $0x14c] ss:$16 sps:$4 sm:$0xff]   ;;  %v326_v62 = vmax.f32 %v325_v58, 0.0  ;;  %v1363_v0 = vld [vmem:[#allocation6 + $0x148] ss:$16 sps:$4 sm:$0xff]   ;;  %v1577_v7 = vmov 0.0  }
  0x77   : > { %v1364_v1 = vld [vmem:[#allocation6 + $0x12c] ss:$16 sps:$4 sm:$0xff]   ;;  %v1366_v3 = vld [vmem:[#allocation6 + $0x128] ss:$16 sps:$4 sm:$0xff]   ;;  %v1371_v8 = vld [vmem:[#allocation8 + $0x30] sm:$0xff]   ;;  %vm1578_vm0 = vmmov 0  }
  0x78   : > { %747 = vmatpush1.bf16.msra.mxu0 %v1291_v19  ;;  %788 = vmatpush1.bf16.msra.mxu1 %v1327_v29  ;;  %v328_v2 = vpack.c.bf16 %v326_v62, %v326_v62  ;;  %v1367_v4 = vld [vmem:[#allocation6 + $0x10c] ss:$16 sps:$4 sm:$0xff]   ;;  %v1369_v5 = vld [vmem:[#allocation6 + $0x108] ss:$16 sps:$4 sm:$0xff]   ;;  %v1373_v10 = vld [vmem:[#allocation8 + $0x20] sm:$0xff]   ;;  %v717_v16 = vshrl.u32 %v716_v15, 7 }
  0x79   : > { %748 = vmatprep.subr.bf16.mxu0 %v1292_v20  ;;  %789 = vmatprep.subr.bf16.mxu1 %v1330_v30  ;;  %v1370_v6 = vld [vmem:[#allocation8 + $0x38] sm:$0xff]   ;;  %v1372_v9 = vld [vmem:[#allocation8 + $0x28] sm:$0xff]   ;;  %v1375_v12 = vld [vmem:[#allocation8 + $0x10] sm:$0xff]   ;;  %vm945_vm1 = vcmask 1040384   ;;  %s1579_s23 = smov [#allocation10]   ;;  %p1847_p1 = scmp.eq.s32.totalorder %s1642_s28, 5 }
  0x7a   : > { %v1374_v11 = vld [vmem:[#allocation8 + $0x18] sm:$0xff]   ;;  %v1376_v13 = vld [vmem:[#allocation8 + $0x8] sm:$0xff]   ;;  %v1377_v14 = vld [vmem:[#allocation8] sm:$0xff]   ;;  %v718_v17 = vsub.s32 0, %v717_v16  ;;  %v722_v20 = vsub.s32 1, %v717_v16  ;;  %v730_v37 = vsub.s32 3, %v717_v16 }
  0x7b   : > { %v394_v18 = vld [vmem:[%s1822_s3] sm:$0xf]  ;;  %s983_s17 = sshll.u32 %s1579_s23, 4  ;;  %s984_s17 = int_to_ptr.vmem [resolvable:$true] %s983_s17 }
  0x7c   : > { %749 = vmatpush1.bf16.msra.mxu0 %v1296_v23  ;;  %790 = vmatpush1.bf16.msra.mxu1 %v1333_v33  ;;  %v719_v19 = vrot.slane %v394_v18, %v718_v17  ;;  %v723_v25 = vrot.slane %v394_v18, %v722_v20  ;;  %s1472_s14 = scalar_lea.vmem %s984_s17, 16  ;;  %s1478_s19 = scalar_lea.vmem %s984_s17, 32 }
  0x7d   : > { %750 = vmatprep.subr.bf16.mxu0 %v1298_v24  ;;  %791 = vmatprep.subr.bf16.mxu1 %v1336_v34  ;;  %p1473_p11 = scmp.ne.s32.totalorder %s984_s17, %s1472_s14  ;;  %p1479_p12 = scmp.lt.s32.totalorder %s984_s17, %s984_s17 }
  0x7e   : > { %p1480_p3 = scmp.lt.s32.totalorder %s1478_s19, %s1472_s14 }
  0x7f   : > { %p1474_p2 = pnand %p1473_p11, %p1847_p1 }
  0x80   : > { %751 = vmatpush1.bf16.msra.mxu0 %v1302_v27  ;;  %792 = vmatpush1.bf16.msra.mxu1 %v1339_v39  ;;  %p1481_p10 = por %p1480_p3, %p1479_p12 }
  0x81   : > { %752 = vmatprep.subr.bf16.mxu0 %v1304_v28  ;;  %793 = vmatprep.subr.bf16.mxu1 %v1342_v40  ;;  %v731_v40 = vrot.slane %v394_v18, %v730_v37  ;;  %p1475_p6 = pneg %p1474_p2 }
  0x83   : > { %p1482_p13 = pnand %p1481_p10, %p1475_p6 }
  0x84   : > { %753 = vmatpush2.bf16.msra.mxu0 %v1308_v31  ;;  %794 = vmatpush2.bf16.msra.mxu1 %v1345_v43 }
  0x85   : > { %754 = vmatprep.subr.bf16.mxu0 %v1310_v32  ;;  %795 = vmatprep.subr.bf16.mxu1 %v1348_v45 }
  0x88   : > { %755 = vmatpush2.bf16.msra.mxu0 %v1314_v36  ;;  %796 = vmatpush2.bf16.msra.mxu1 %v1351_v47 }
  0x89   : > { %756 = vmatprep.subr.bf16.mxu0 %v1316_v38  ;;  %797 = vmatprep.subr.bf16.mxu1 %v1352_v48  ;;  %v726_v38 = vsub.s32 2, %v717_v16 }
  0x8c   : > { %757 = vmatpush2.bf16.msra.mxu0 %v1320_v41  ;;  %798 = vmatpush2.bf16.msra.mxu1 %v1354_v51 }
  0x8d   : > { %758 = vmatprep.subr.bf16.mxu0 %v1322_v42  ;;  %799 = vmatprep.subr.bf16.mxu1 %v1355_v52  ;;  %v727_v42 = vrot.slane %v394_v18, %v726_v38 }
  0x90   : > { %759 = vmatpush2.bf16.msra.mxu0 %v1326_v44  ;;  %800 = vmatpush2.bf16.msra.mxu1 %v1357_v55  ;;  %v856_v55 = vld [vmem:[%s1824_s5] sm:$0x1] }
  0x91   : > { %760 = vmatprep.subr.bf16.mxu0 %v1328_v46  ;;  %801 = vmatprep.subr.bf16.mxu1 %v1358_v56 }
  0x94   : > { %761 = vmatpush2.bf16.msra.mxu0 %v1332_v49  ;;  %802 = vmatpush2.bf16.msra.mxu1 %v1360_v60 }
  0x95   : > { %762 = vmatprep.subr.bf16.mxu0 %v1334_v50  ;;  %803 = vmatprep.subr.bf16.mxu1 %v1361_v61 }
  0x98   : > { %763 = vmatpush2.bf16.msra.mxu0 %v1338_v53  ;;  %804 = vmatpush2.bf16.msra.mxu1 %v1363_v0 }
  0x99   : > { %764 = vmatprep.subr.bf16.mxu0 %v1340_v54  ;;  %805 = vmatprep.subr.bf16.mxu1 %v1364_v1 }
  0x9c   : > { %765 = vmatpush2.bf16.msra.mxu0 %v1344_v57  ;;  %806 = vmatpush2.bf16.msra.mxu1 %v1366_v3 }
  0x9d   : > { %766 = vmatprep.subr.bf16.mxu0 %v1346_v59  ;;  %807 = vmatprep.subr.bf16.mxu1 %v1367_v4 }
  0xa0   : > { %767 = vmatpush2.bf16.msra.mxu0 %v1350_v63  ;;  %808 = vmatpush2.bf16.msra.mxu1 %v1369_v5 }
  0xa1   : > { %1174 = vmatprep.subr.bf16.mxu0 %v1577_v7 }
  0xa3   : > { %769 = vmatmul.mubr.bf16.vlgmr.msra.gmra.mxu0 %v328_v2  ;;  %810 = vmatmul.mubr.bf16.vlgmr.msra.gmra.mxu1 %v328_v2 }
  0xa4   : > { %1175 = vmatpush3.bf16.msra.mxu0 %v1370_v6  ;;  %1190 = vmatprep.mubr.msk.bf16.mxu0 %vm1578_vm0, %v1577_v7 }
  0xa5   : > { %1176 = vmatprep.subr.bf16.mxu0 %v1577_v7 }
  0xa8   : > { %1177 = vmatpush3.bf16.msra.mxu0 %v1371_v8 }
  0xa9   : > { %1178 = vmatprep.subr.bf16.mxu0 %v1577_v7 }
  0xac   : > { %1179 = vmatpush3.bf16.msra.mxu0 %v1372_v9 }
  0xad   : > { %1180 = vmatprep.subr.bf16.mxu0 %v1577_v7 }
  0xb0   : > { %1181 = vmatpush3.bf16.msra.mxu0 %v1373_v10 }
  0xb1   : > { %1182 = vmatprep.subr.bf16.mxu0 %v1577_v7 }
  0xb4   : > { %1183 = vmatpush3.bf16.msra.mxu0 %v1374_v11 }
  0xb5   : > { %1184 = vmatprep.subr.bf16.mxu0 %v1577_v7 }
  0xb8   : > { %1185 = vmatpush3.bf16.msra.mxu0 %v1375_v12 }
  0xb9   : > { %1186 = vmatprep.subr.bf16.mxu0 %v1577_v7 }
  0xbc   : > { %1187 = vmatpush3.bf16.msra.mxu0 %v1376_v13 }
  0xbd   : > { %1188 = vmatprep.subr.bf16.mxu0 %v1577_v7 }
  0xc0   : > { %1189 = vmatpush3.bf16.msra.mxu0 %v1377_v14 }
 0x163   : > { %v770_v21 = vpop.f32.mrf.mxu0  ;;  %v811_v29 = vpop.f32.mrf.mxu1 }
 0x164   : > { %v771_v22 = vadd.f32 %v770_v21, %v719_v19  ;;  %v812_v45 = vadd.f32 %v811_v29, %v727_v42 }
 0x165   : > { %v772_v23 = vpop.f32.mrf.mxu0  ;;  %v813_v31 = vpop.f32.mrf.mxu1 }
 0x166   : > { %v1150_v24 = vmul.f32 -1.442695, %v771_v22  ;;  %v773_v28 = vadd.f32 %v772_v23, %v723_v25  ;;  %v814_v43 = vadd.f32 %v813_v31, %v731_v40 }
 0x167   : > { %v774_v26 = vpop.f32.mrf.mxu0  ;;  %v815_v32 = vpop.f32.mrf.mxu1 }
 0x168   : > { %1378 = vpow2.f32 %v1150_v24  ;;  %v1151_v30 = vmul.f32 -1.442695, %v773_v28 }
 0x169   : > { %v775_v27 = vpop.f32.mrf.mxu0  ;;  %v816_v33 = vpop.f32.mrf.mxu1 }
 0x16a   : > { %1380 = vpow2.f32 %v1151_v30 }
 0x175   : > { %v1379_v34 = vpop.eup %1378 }
 0x176   : > { %v821_v36 = vadd.f32 1.0, %v1379_v34 }
 0x177   : > { %v1381_v39 = vpop.eup %1380 }
 0x178   : > { %1382 = vrcp.f32 %v821_v36  ;;  %v827_v41 = vadd.f32 1.0, %v1381_v39 }
 0x17a   : > { %1384 = vrcp.f32 %v827_v41 }
 0x185   : > { %v1383_v44 = vpop.eup %1382 }
 0x186   : > { %v830_v46 = vmul.f32 %v1383_v44, %v814_v43 }
 0x187   : > { %v1385_v48 = vpop.eup %1384 }
 0x188   : > { %v831_v47 = vadd.f32 %v830_v46, %v812_v45  ;;  %v833_v49 = vsub.f32 1.0, %v1385_v48  ;;  %v835_v52 = vmul.f32 %v1385_v48, %v1757_v35 }
 0x18a   : > { %1386 = vtanh.f32 %v831_v47 }
 0x197   : > { %v1387_v50 = vpop.eup %1386 }
 0x198   : > { %v834_v51 = vmul.f32 %v1387_v50, %v833_v49 }
 0x19a   : > { %v836_v53 = vadd.f32 %v835_v52, %v834_v51 }
 0x19c   : > { %837 = vst [vmem:[#allocation2] sm:$0x1] %v836_v53  ;;  %v839_v54 = vpack.c.bf16 %v836_v53, %v836_v53  ;;  %838 = vst [vmem:[#allocation10] sm:$0x1] %v836_v53 }
 0x19e   : > { %1191 = vmatmul.mubr.bf16.vlgmr.msra.gmra.mxu0 %v839_v54 }
 0x25e   : > { %v939_v56 = vpop.f32.mrf.mxu0 }
 0x25f   : > { %v940_v57 = vadd.f32 %v939_v56, %v856_v55 }
 0x260   : > { %v1192_v58 = vpop.f32.mrf.mxu0 }
 0x261   : > { %v946_v59 = vsel %vm945_vm1, %v940_v57, -inf }
 0x262   : > { %947 = vmax.xlane.f32.xlu0 %v946_v59  ;;  %v942_v60 = vpop.f32.mrf.mxu0 }
 0x264   : > { %v1193_v61 = vpop.f32.mrf.mxu0 }
 0x2eb   : > { %v948_v62 = vpop.xlane.xlu0 %947 }
 0x2ec   : > { %v949_v35 = vsub.f32 %v940_v57, %v948_v62 }
 0x2ee   : > { %v950_v63 = vmul.f32 1.442695, %v949_v35 }
 0x2f0   : > { %1388 = vpow2.f32 %v950_v63 }
 0x2fd   : > { %v1389_v0 = vpop.eup %1388 }
 0x2fe   : > { %v952_v1 = vsel %vm945_vm1, %v1389_v0, 0.0 }
 0x2ff   : > { %953 = vadd.xlane.f32.xlu0 %v952_v1 }
 0x300   : > { %1485 = shalt.err (!%p1482_p13)
}
 0x301   : > { %p1848_p5 = pmov %p1847_p1  ;;  %s1160_s11 = sshll.u32 %s1642_s28, 4 }
 0x302   : > { %s972_s13 = sshll.u32 %s315_s2, 4  ;;  %s970_s30 = scalar_lea.hbm %s1825_s6, %s1160_s11  ;;  %s973_s13 = int_to_ptr.vmem [resolvable:$true] %s972_s13 }
 0x303   : > { %1206 = dma.vmem_to_hbm [thread:$0]  (%p1848_p5), %s984_s17, 16, %s1826_s7, [#allocation11]  }
 0x304   : > { %s960_s18 = scalar_lea.sflag [#allocation5], %s1739_s29  ;;  %s1496_s21 = scalar_lea.vmem %s973_s13, 16 }
 0x305   : > { %p1497_p8 = scmp.ne.s32.totalorder %s973_s13, %s1496_s21  ;;  %p1849_p0 = scmp.ne.s32.totalorder %s1840_s16, 0 }
 0x306   : > { %s1580_s22 = smov [#allocation9]  }
 0x307   : > { %p1498_p4 = pnand %p1497_p8, %p1849_p0  ;;  %s1500_s23 = sshll.u32 %s1580_s22, 4  ;;  %s1501_s23 = int_to_ptr.vmem [resolvable:$false] %s1500_s23 }
 0x308   : > { %s1502_s17 = scalar_lea.vmem %s1501_s23, 32  ;;  %p1503_p7 = scmp.lt.s32.totalorder %s973_s13, %s1501_s23 }
 0x309   : > { %p1499_p9 = pneg %p1498_p4  ;;  %p1504_p11 = scmp.lt.s32.totalorder %s1502_s17, %s1496_s21 }
 0x30b   : > { %p1505_p1 = por %p1504_p11, %p1503_p7 }
 0x30d   : > { %p1506_p2 = pnand %p1505_p1, %p1499_p9 }
 0x388   : > { %v954_v2 = vpop.xlane.xlu0 %953 }
 0x389   : > { %1390 = vlog2.f32 %v954_v2 }
 0x396   : > { %v1391_v3 = vpop.eup %1390 }
 0x397   : > { %v956_v4 = vmul.f32 0.6931472, %v1391_v3 }
 0x399   : > { %v957_v5 = vsub.f32 %v949_v35, %v956_v4 }
 0x39b   : > { %958 = vst [vmem:[%s315_s2] sm:$0x1] %v957_v5 }
 0x39c   : > { %1509 = shalt.err (!%p1506_p2)
}
 0x39d   : > { %s1510_s14 = scalar_lea.hbm %s970_s30, 16  ;;  %s1514_s19 = scalar_lea.hbm %s1825_s6, 96 }
 0x39e   : > { %p1511_p6 = scmp.ne.s32.totalorder %s970_s30, %s1510_s14  ;;  %p1515_p10 = scmp.lt.s32.totalorder %s970_s30, %s1825_s6 }
 0x39f   : > { %p1516_p13 = scmp.lt.s32.totalorder %s1514_s19, %s1510_s14 }
 0x3a0   : > { %p1512_p12 = pnand %p1511_p6, %p1849_p0 }
 0x3a1   : > { %p1517_p5 = por %p1516_p13, %p1515_p10 }
 0x3a2   : > { %p1513_p3 = pneg %p1512_p12 }
 0x3a4   : > { %p1518_p8 = pnand %p1517_p5, %p1513_p3 }
 0x3a6   : > { %1521 = shalt.err (!%p1518_p8)
}
 0x3a7   : > { %1204 = dma.vmem_to_hbm [thread:$0]  (%p1849_p0), %s973_s13, 16, %s970_s30, %s960_s18  }
 0x3a8   : > { %p1850_p4 = scmp.eq.s32.totalorder %s1642_s28, 5 }
 0x3aa   : > { %1547 = dma.done.wait (%p1850_p4), [#allocation11], 16   ;;  %p1851_p9 = pmov %p1850_p4 }
 0x3ac   : > { %1549 = vsyncadd (%p1851_p9), [#allocation11], 4294967280 }
 0x3ad PF: > { %p1232_p7 = scmp.ge.s32.totalorder %s1568_s27, 2  ;;  %s999_s11 = sand.u32 1, %s1556_s24  }
 0x3ae   : > { %p1852_p11 = scmp.ne.s32.totalorder %s1834_s8, 0  ;;  %s1000_s4 = scalar_lea.sflag [#allocation5], %s999_s11 }
 0x3b0   : > { %p1222_p1 = pnand %p1232_p7, %p1852_p11 }
 0x3b2   : > { %p1223_p2 = pneg %p1222_p1 }
 0x3b4   : > { %1551 = dma.done.wait (%p1223_p2), %s1000_s4, 16  }
 0x3b5   : > { %1553 = vsyncadd (%p1223_p2), %s1000_s4, 4294967280  ;;  %p23_p0 = scmp.ge.s32.totalorder %s1693_s10, 8   ;;  %s1853_s24 = smov %s1560_s25 }
 0x3b6   : > { %s1854_s25 = smov %s1564_s26  ;;  %s1855_s26 = smov %s1702_s15 }
 0x3b7   : > { %s1856_s27 = smov %s1693_s10  ;;  %25 = sbr.rel (!%p23_p0) target bundleno = 10 (0xa), region = 109 }
 0x3bc   :  { %1004 = vsyncpa [#allocation4], 1 }
 0x3bd   :  { %1006 = vsyncpa [#allocation4 + $0x1], 1 }
 0x3be   :  { %1007 = vsyncpa [#allocation7], 1 }
 0x3bf   :  { %1008 = vsyncpa [#allocation5], 1 }
 0x3c0   :  { %1010 = vsyncpa [#allocation5 + $0x1], 1 }
 0x3c1   :  { %1011 = vsyncpa [#allocation11], 1 }

</bundles_post_ra>
